<compile_context>
chip_gen: v7x
topology: tpu7x:2x2x1
jax: 0.10.0
libtpu: 0.0.40
codegen_flags: <defaults>
</compile_context>

<pallas_src>
import functools

import jax
import jax.numpy as jnp
from jax.experimental import pallas as pl
from jax.experimental.pallas import tpu as pltpu


def _round_up(x, m):
    return ((x + m - 1) // m) * m


def mlp_kernel(x_ref, w1t_ref, b1_ref, wht_ref, bh_ref, o_ref, h_ref, *,
               num_hidden):
    # x_ref:   (tm, Cinp)     row tile of the (padded) input, compute dtype
    # w1t_ref: (Cinp, Hp)     fc1 weight, pre-transposed to (K, N)
    # b1_ref:  (1, Hp)        fc1 bias (f32)
    # wht_ref: (Lw, Hp, Hp)   stacked hidden weights, pre-transposed
    # bh_ref:  (Lw, 1, Hp)    stacked hidden biases (f32)
    # o_ref:   (tm, Hp)       output tile
    # h_ref:   (tm, Hp) f32   VMEM scratch for the running activation
    wdt = w1t_ref.dtype
    h_ref[...] = (
        jnp.dot(x_ref[...], w1t_ref[...], preferred_element_type=jnp.float32)
        + b1_ref[...]
    )
    for l in range(num_hidden):          # static unroll (L is compile-time const)
        h_ref[...] = (
            jnp.dot(h_ref[...].astype(wdt), wht_ref[l],
                    preferred_element_type=jnp.float32)
            + bh_ref[l]
        )
    o_ref[...] = h_ref[...].astype(o_ref.dtype)


def mlp_forward(x, w1, b1, wh, bh, *, tm=256, compute_dtype=None):
    """x: (B, S, Cin) -> (B, S, H); matches torch MLP.forward (no activation)."""
    B, S, Cin = x.shape
    H = w1.shape[0]
    L = wh.shape[0]
    M = B * S

    cdt = compute_dtype if compute_dtype is not None else x.dtype
    Cinp = _round_up(Cin, 128)          # lane-dense K for fc1
    Hp = _round_up(H, 128)              # lane-dense N / hidden width
    tm_eff = min(tm, _round_up(M, 8))   # big tile by default, clamp for tiny M
    Mp = _round_up(M, tm_eff)           # pad ragged row counts
    Lw = max(L, 1)                      # keep block shapes non-empty if L == 0

    # ---- one-time wrapper-side layout work: transpose + zero-pad + cast ----
    w1t = jnp.zeros((Cinp, Hp), cdt).at[:Cin, :H].set(w1.T.astype(cdt))
    b1p = jnp.zeros((1, Hp), jnp.float32).at[:, :H].set(b1.astype(jnp.float32))
    wht = jnp.zeros((Lw, Hp, Hp), cdt)
    bhp = jnp.zeros((Lw, 1, Hp), jnp.float32)
    if L > 0:
        wht = wht.at[:L, :H, :H].set(jnp.transpose(wh, (0, 2, 1)).astype(cdt))
        bhp = bhp.at[:L, :, :H].set(bh.astype(jnp.float32)[:, None, :])
    x2 = jnp.zeros((Mp, Cinp), cdt).at[:M, :Cin].set(
        x.reshape(M, Cin).astype(cdt))

    # ---- VMEM budget (weights default double-buffered, io double-buffered) ----
    bpe = jnp.dtype(cdt).itemsize
    weight_bytes = (Cinp * Hp + Lw * Hp * Hp) * bpe + (Hp + Lw * Hp) * 4
    io_bytes = 2 * tm_eff * Cinp * bpe + 2 * tm_eff * Hp * jnp.dtype(x.dtype).itemsize
    scratch_bytes = tm_eff * Hp * 4
    budget = 2 * weight_bytes + io_bytes + scratch_bytes
    vmem_limit = min(int(budget * 1.5) + (8 << 20), 96 << 20)
    # TODO(synk): on v7x (64 MiB VMEM/TC) large L*Hp*Hp weight stacks should be
    # single-buffered / layer-tiled; at these sizes the default is fine.

    out = pl.pallas_call(
        functools.partial(mlp_kernel, num_hidden=L),
        out_shape=jax.ShapeDtypeStruct((Mp, Hp), x.dtype),
        grid_spec=pltpu.PrefetchScalarGridSpec(
            num_scalar_prefetch=0,
            grid=(Mp // tm_eff,),
            in_specs=[
                pl.BlockSpec((tm_eff, Cinp), lambda i: (i, 0)),
                pl.BlockSpec((Cinp, Hp), lambda i: (0, 0)),
                pl.BlockSpec((1, Hp), lambda i: (0, 0)),
                pl.BlockSpec((Lw, Hp, Hp), lambda i: (0, 0, 0)),
                pl.BlockSpec((Lw, 1, Hp), lambda i: (0, 0, 0)),
            ],
            out_specs=pl.BlockSpec((tm_eff, Hp), lambda i: (i, 0)),
            scratch_shapes=[pltpu.VMEM((tm_eff, Hp), jnp.float32)],
        ),
        compiler_params=pltpu.CompilerParams(
            dimension_semantics=("parallel",),
            vmem_limit_bytes=vmem_limit),
    )(x2, w1t, b1p, wht, bhp)

    return out[:M, :H].reshape(B, S, H)


def init_params(key, input_size, hidden, total_hidden_layer):
    """Deterministic synthetic init mirroring the shapes of nn.Linear."""
    k1, k2, k3, k4 = jax.random.split(key, 4)
    scale1 = 1.0 / jnp.sqrt(input_size)
    scaleh = 1.0 / jnp.sqrt(hidden)
    w1 = jax.random.uniform(k1, (hidden, input_size), jnp.float32,
                            -scale1, scale1)
    b1 = jax.random.uniform(k2, (hidden,), jnp.float32, -scale1, scale1)
    wh = jax.random.uniform(k3, (total_hidden_layer, hidden, hidden),
                            jnp.float32, -scaleh, scaleh)
    bh = jax.random.uniform(k4, (total_hidden_layer, hidden),
                            jnp.float32, -scaleh, scaleh)
    return w1, b1, wh, bh


def mlp_ref(x, w1, b1, wh, bh):
    h = x @ w1.T + b1
    for l in range(wh.shape[0]):
        h = h @ wh[l].T + bh[l]
    return h


if __name__ == "__main__":
    input_size, hidden, n_hidden = 32, 64, 2
    key = jax.random.PRNGKey(0)
    kx, kp, kx2 = jax.random.split(key, 3)
    w1, b1, wh, bh = init_params(kp, input_size, hidden, n_hidden)

    # --- case 1: aligned row count (f32 compute) ---
    B, S = 2, 8
    x = jax.random.normal(kx, (B, S, input_size), jnp.float32)
    out = jax.block_until_ready(mlp_forward(x, w1, b1, wh, bh))
    ref = mlp_ref(x, w1, b1, wh, bh)
    assert out.shape == (B, S, hidden)
    assert jnp.allclose(out, ref, atol=1e-4, rtol=1e-4), "f32 mismatch"

    # --- case 2: ragged row count exercising the row-padding path ---
    B2, S2 = 3, 10
    x2 = jax.random.normal(kx2, (B2, S2, input_size), jnp.float32)
    out2 = jax.block_until_ready(mlp_forward(x2, w1, b1, wh, bh))
    ref2 = mlp_ref(x2, w1, b1, wh, bh)
    assert out2.shape == (B2, S2, hidden)
    assert jnp.allclose(out2, ref2, atol=1e-4, rtol=1e-4), "ragged mismatch"

    # --- case 3: bf16 compute path (recommended on v6e/v7x), loose tolerance ---
    out_bf = jax.block_until_ready(
        mlp_forward(x, w1, b1, wh, bh, compute_dtype=jnp.bfloat16))
    err = jnp.max(jnp.abs(out_bf.astype(jnp.float32) - ref))
    assert err < 0.1 * (jnp.max(jnp.abs(ref)) + 1e-6), "bf16 path diverged"

    print("KERNEL_OK")
</pallas_src>

<mosaic_0001>
module attributes {stable_mosaic.version = 11 : i64} {
  func.func @mlp_kernel(%arg0: i32, %arg1: memref<16x128xf32, #tpu.memory_space<vmem>>, %arg2: memref<128x128xf32, #tpu.memory_space<vmem>>, %arg3: memref<1x128xf32, #tpu.memory_space<vmem>>, %arg4: memref<2x128x128xf32, #tpu.memory_space<vmem>>, %arg5: memref<2x1x128xf32, #tpu.memory_space<vmem>>, %arg6: memref<16x128xf32, #tpu.memory_space<vmem>>, %arg7: memref<16x128xf32, #tpu.memory_space<vmem>>) attributes {dimension_semantics = [#tpu.dimension_semantics<parallel>], iteration_bounds = array<i64: 1>, scalar_prefetch = 0 : i64, scratch_operands = 1 : i64, tpu.core_type = #tpu.core_type<tc>, window_params = [{transform_indices = @transform_0, window_bounds = array<i64: 16, 128>}, {pipeline_mode = #tpu.pipeline_mode<synchronous>, transform_indices = @transform_1, window_bounds = array<i64: 128, 128>}, {pipeline_mode = #tpu.pipeline_mode<synchronous>, transform_indices = @transform_2, window_bounds = array<i64: 1, 128>}, {pipeline_mode = #tpu.pipeline_mode<synchronous>, transform_indices = @transform_3, window_bounds = array<i64: 2, 128, 128>}, {pipeline_mode = #tpu.pipeline_mode<synchronous>, transform_indices = @transform_4, window_bounds = array<i64: 2, 1, 128>}, {transform_indices = @transform_5, window_bounds = array<i64: 16, 128>}]} {
    %c0 = arith.constant 0 : index
    %c0_0 = arith.constant 0 : index
    %0 = vector.load %arg1[%c0, %c0_0] : memref<16x128xf32, #tpu.memory_space<vmem>>, vector<16x128xf32>
    %c0_1 = arith.constant 0 : index
    %c0_2 = arith.constant 0 : index
    %1 = vector.load %arg2[%c0_1, %c0_2] : memref<128x128xf32, #tpu.memory_space<vmem>>, vector<128x128xf32>
    %cst = arith.constant dense<0.000000e+00> : vector<16x128xf32>
    %2 = tpu.matmul %0, %1, %cst {dimension_numbers = #tpu.dot_dimension_numbers<[1], [0], [0], [1], [0, 0, 1, 1], [], []>} : vector<16x128xf32>, vector<128x128xf32>, vector<16x128xf32> -> vector<16x128xf32>
    %c0_3 = arith.constant 0 : index
    %c0_4 = arith.constant 0 : index
    %3 = vector.load %arg3[%c0_3, %c0_4] : memref<1x128xf32, #tpu.memory_space<vmem>>, vector<1x128xf32>
    %4 = vector.broadcast %3 : vector<1x128xf32> to vector<16x128xf32>
    %5 = arith.addf %2, %4 : vector<16x128xf32>
    %c0_5 = arith.constant 0 : index
    %c0_6 = arith.constant 0 : index
    %6 = vector.load %arg7[%c0_5, %c0_6] : memref<16x128xf32, #tpu.memory_space<vmem>>, vector<16x128xf32>
    tpu.vector_store %arg7[%c0_5, %c0_6], %5 {strides = array<i32>} : memref<16x128xf32, #tpu.memory_space<vmem>>, vector<16x128xf32>,
    %c0_7 = arith.constant 0 : index
    %c0_8 = arith.constant 0 : index
    %7 = vector.load %arg7[%c0_7, %c0_8] : memref<16x128xf32, #tpu.memory_space<vmem>>, vector<16x128xf32>
    %c0_9 = arith.constant 0 : index
    %c0_10 = arith.constant 0 : index
    %c0_11 = arith.constant 0 : index
    %8 = vector.load %arg4[%c0_9, %c0_10, %c0_11] : memref<2x128x128xf32, #tpu.memory_space<vmem>>, vector<1x128x128xf32>
    %9 = vector.shape_cast %8 : vector<1x128x128xf32> to vector<128x128xf32>
    %cst_12 = arith.constant dense<0.000000e+00> : vector<16x128xf32>
    %10 = tpu.matmul %7, %9, %cst_12 {dimension_numbers = #tpu.dot_dimension_numbers<[1], [0], [0], [1], [0, 0, 1, 1], [], []>} : vector<16x128xf32>, vector<128x128xf32>, vector<16x128xf32> -> vector<16x128xf32>
    %c0_13 = arith.constant 0 : index
    %c0_14 = arith.constant 0 : index
    %c0_15 = arith.constant 0 : index
    %11 = vector.load %arg5[%c0_13, %c0_14, %c0_15] : memref<2x1x128xf32, #tpu.memory_space<vmem>>, vector<1x1x128xf32>
    %12 = vector.shape_cast %11 : vector<1x1x128xf32> to vector<1x128xf32>
    %13 = vector.broadcast %12 : vector<1x128xf32> to vector<16x128xf32>
    %14 = arith.addf %10, %13 : vector<16x128xf32>
    %c0_16 = arith.constant 0 : index
    %c0_17 = arith.constant 0 : index
    %15 = vector.load %arg7[%c0_16, %c0_17] : memref<16x128xf32, #tpu.memory_space<vmem>>, vector<16x128xf32>
    tpu.vector_store %arg7[%c0_16, %c0_17], %14 {strides = array<i32>} : memref<16x128xf32, #tpu.memory_space<vmem>>, vector<16x128xf32>,
    %c0_18 = arith.constant 0 : index
    %c0_19 = arith.constant 0 : index
    %16 = vector.load %arg7[%c0_18, %c0_19] : memref<16x128xf32, #tpu.memory_space<vmem>>, vector<16x128xf32>
    %c1 = arith.constant 1 : index
    %c0_20 = arith.constant 0 : index
    %c0_21 = arith.constant 0 : index
    %17 = vector.load %arg4[%c1, %c0_20, %c0_21] : memref<2x128x128xf32, #tpu.memory_space<vmem>>, vector<1x128x128xf32>
    %18 = vector.shape_cast %17 : vector<1x128x128xf32> to vector<128x128xf32>
    %cst_22 = arith.constant dense<0.000000e+00> : vector<16x128xf32>
    %19 = tpu.matmul %16, %18, %cst_22 {dimension_numbers = #tpu.dot_dimension_numbers<[1], [0], [0], [1], [0, 0, 1, 1], [], []>} : vector<16x128xf32>, vector<128x128xf32>, vector<16x128xf32> -> vector<16x128xf32>
    %c1_23 = arith.constant 1 : index
    %c0_24 = arith.constant 0 : index
    %c0_25 = arith.constant 0 : index
    %20 = vector.load %arg5[%c1_23, %c0_24, %c0_25] : memref<2x1x128xf32, #tpu.memory_space<vmem>>, vector<1x1x128xf32>
    %21 = vector.shape_cast %20 : vector<1x1x128xf32> to vector<1x128xf32>
    %22 = vector.broadcast %21 : vector<1x128xf32> to vector<16x128xf32>
    %23 = arith.addf %19, %22 : vector<16x128xf32>
    %c0_26 = arith.constant 0 : index
    %c0_27 = arith.constant 0 : index
    %24 = vector.load %arg7[%c0_26, %c0_27] : memref<16x128xf32, #tpu.memory_space<vmem>>, vector<16x128xf32>
    tpu.vector_store %arg7[%c0_26, %c0_27], %23 {strides = array<i32>} : memref<16x128xf32, #tpu.memory_space<vmem>>, vector<16x128xf32>,
    %c0_28 = arith.constant 0 : index
    %c0_29 = arith.constant 0 : index
    %25 = vector.load %arg7[%c0_28, %c0_29] : memref<16x128xf32, #tpu.memory_space<vmem>>, vector<16x128xf32>
    %c0_30 = arith.constant 0 : index
    %c0_31 = arith.constant 0 : index
    %26 = vector.load %arg6[%c0_30, %c0_31] : memref<16x128xf32, #tpu.memory_space<vmem>>, vector<16x128xf32>
    tpu.vector_store %arg6[%c0_30, %c0_31], %25 {strides = array<i32>} : memref<16x128xf32, #tpu.memory_space<vmem>>, vector<16x128xf32>,
    return
  }
  func.func @transform_0(%arg0: i32) -> (i32, i32) {
    %c0_i32 = arith.constant 0 : i32
    %c0_i32_0 = arith.constant 0 : i32
    return %arg0, %c0_i32 : i32, i32
  }
  func.func @transform_1(%arg0: i32) -> (i32, i32) {
    %c0_i32 = arith.constant 0 : i32
    %c0_i32_0 = arith.constant 0 : i32
    %c0_i32_1 = arith.constant 0 : i32
    return %c0_i32, %c0_i32_0 : i32, i32
  }
  func.func @transform_2(%arg0: i32) -> (i32, i32) {
    %c0_i32 = arith.constant 0 : i32
    %c0_i32_0 = arith.constant 0 : i32
    %c0_i32_1 = arith.constant 0 : i32
    return %c0_i32, %c0_i32_0 : i32, i32
  }
  func.func @transform_3(%arg0: i32) -> (i32, i32, i32) {
    %c0_i32 = arith.constant 0 : i32
    %c0_i32_0 = arith.constant 0 : i32
    %c0_i32_1 = arith.constant 0 : i32
    %c0_i32_2 = arith.constant 0 : i32
    return %c0_i32, %c0_i32_0, %c0_i32_1 : i32, i32, i32
  }
  func.func @transform_4(%arg0: i32) -> (i32, i32, i32) {
    %c0_i32 = arith.constant 0 : i32
    %c0_i32_0 = arith.constant 0 : i32
    %c0_i32_1 = arith.constant 0 : i32
    %c0_i32_2 = arith.constant 0 : i32
    return %c0_i32, %c0_i32_0, %c0_i32_1 : i32, i32, i32
  }
  func.func @transform_5(%arg0: i32) -> (i32, i32) {
    %c0_i32 = arith.constant 0 : i32
    %c0_i32_0 = arith.constant 0 : i32
    return %arg0, %c0_i32 : i32, i32
  }
}

</mosaic_0001>

<bundles_post_ra>
// kernel: tpu_custom_call.1
= control target key start
LH: loop header
LB: loop body
LE: loop exit
PB: predicated region body
PF: predicated region fallthrough
CT: control target
= control target key end

     0   :  { %10 = vsyncpa [#allocation4], 0  ;;  %s863_s0 = inlined_call_operand.hbm [shape: f32[16,128], index: 0, kind: input, shape index: {}]   ;;  %s864_s1 = inlined_call_operand.hbm [shape: f32[128,128], index: 1, kind: input, shape index: {}]   ;;  %s865_s2 = inlined_call_operand.vmem [shape: f32[1,128], index: 2, kind: input, shape index: {}]   ;;  %s866_s3 = inlined_call_operand.hbm [shape: f32[2,128,128], index: 3, kind: input, shape index: {}]   ;;  %s867_s4 = inlined_call_operand.vmem [shape: f32[2,1,128], index: 4, kind: input, shape index: {}]   ;;  %s868_s5 = inlined_call_operand.hbm [shape: f32[16,128], index: 5, kind: output, shape index: {}]  }
   0x1   :  { %11 = vsyncpa [#allocation7], 0 }
   0x2   :  { %12 = vsyncpa [#allocation5], 0  ;;  %s751_s18 = smov [#allocation6]   ;;  %s752_s20 = smov [#allocation3]  }
   0x3   :  { %s30_s19 = sshll.u32 %s751_s18, 4  ;;  %s18_s21 = sshll.u32 %s752_s20, 4  ;;  %s31_s19 = int_to_ptr.vmem [resolvable:$true] %s30_s19  ;;  %s787_s21 = int_to_ptr.vmem [resolvable:$true] %s18_s21 }
   0x4   :  { %s657_s24 = scalar_lea.hbm %s864_s1, 2048 }
   0x5   :  { %p658_p0 = scmp.ne.s32.totalorder %s864_s1, %s657_s24  ;;  %p661_p1 = scmp.lt.u32.totalorder %s657_s24, %s864_s1 }
   0x7   :  { %p663_p2 = pnand %p661_p1, %p658_p0 }
   0x9   :  { %666 = shalt.err (!%p663_p2)
}
   0xa   :  { %s667_s29 = scalar_lea.vmem %s31_s19, 2048  ;;  %p672_p4 = scmp.lt.s32.totalorder %s31_s19, %s31_s19 }
   0xb   :  { %p668_p3 = scmp.ne.s32.totalorder %s31_s19, %s667_s29  ;;  %p673_p5 = scmp.lt.s32.totalorder %s667_s29, %s667_s29 }
   0xd   :  { %p674_p6 = por %p673_p5, %p672_p4 }
   0xf   :  { %p675_p7 = pnand %p674_p6, %p668_p3 }
  0x11   :  { %678 = shalt.err (!%p675_p7)
}
  0x12   :  { %s753_s30 = smov 128   ;;  %s754_s6 = smov 8  }
  0x13   :  { %36 = dma.hbm_to_vmem [thread:$0]  %s864_s1, 2048, %s31_s19, [#allocation7], %s753_s30, %s753_s30, %s754_s6  }
  0x14   :  { %s679_s11 = scalar_lea.hbm %s863_s0, 256 }
  0x15   :  { %p680_p8 = scmp.ne.s32.totalorder %s863_s0, %s679_s11  ;;  %p683_p9 = scmp.lt.u32.totalorder %s679_s11, %s863_s0 }
  0x17   :  { %p685_p10 = pnand %p683_p9, %p680_p8 }
  0x19   :  { %688 = shalt.err (!%p685_p10)
}
  0x1a   :  { %s689_s16 = scalar_lea.vmem %s787_s21, 256  ;;  %p694_p12 = scmp.lt.s32.totalorder %s787_s21, %s787_s21 }
  0x1b   :  { %p690_p11 = scmp.ne.s32.totalorder %s787_s21, %s689_s16  ;;  %p695_p13 = scmp.lt.s32.totalorder %s689_s16, %s689_s16 }
  0x1d   :  { %p696_p0 = por %p695_p13, %p694_p12 }
  0x1f   :  { %p697_p1 = pnand %p696_p0, %p690_p11 }
  0x21   :  { %700 = shalt.err (!%p697_p1)
}
  0x22   :  { %24 = dma.hbm_to_vmem [thread:$0]  %s863_s0, 256, %s787_s21, [#allocation4], %s753_s30, %s753_s30, %s754_s6  }
  0x23   :  { %s755_s18 = smov [#allocation8]   ;;  %s701_s23 = scalar_lea.hbm %s866_s3, 4096 }
  0x24   :  { %s44_s19 = sshll.u32 %s755_s18, 4  ;;  %p702_p2 = scmp.ne.s32.totalorder %s866_s3, %s701_s23  ;;  %s45_s19 = int_to_ptr.vmem [resolvable:$true] %s44_s19 }
  0x25   :  { %p705_p3 = scmp.lt.u32.totalorder %s701_s23, %s866_s3 }
  0x27   :  { %p707_p4 = pnand %p705_p3, %p702_p2 }
  0x29   :  { %710 = shalt.err (!%p707_p4)
}
  0x2a   :  { %s711_s28 = scalar_lea.vmem %s45_s19, 4096  ;;  %p716_p6 = scmp.lt.s32.totalorder %s45_s19, %s45_s19 }
  0x2b   :  { %p712_p5 = scmp.ne.s32.totalorder %s45_s19, %s711_s28  ;;  %p717_p7 = scmp.lt.s32.totalorder %s711_s28, %s711_s28 }
  0x2d   :  { %p718_p8 = por %p717_p7, %p716_p6 }
  0x2f   :  { %p719_p9 = pnand %p718_p8, %p712_p5 }
  0x31   :  { %722 = shalt.err (!%p719_p9)
}
  0x32   :  { %50 = dma.hbm_to_vmem [thread:$0]  %s866_s3, 4096, %s45_s19, [#allocation7], %s753_s30, %s753_s30, %s754_s6  }
  0x33   :  { %745 = dma.done.wait [#allocation4], 256  }
  0x34   :  { %746 = vsyncadd [#allocation4], 4294967040 }
  0x35   :  { %747 = dma.done.wait [#allocation7], 6144  }
  0x36   :  { %748 = vsyncadd [#allocation7], 4294961152  ;;  %v64_v0 = vld [vmem:[#allocation6] sm:$0xff]  ;;  %v65_v1 = vld [vmem:[#allocation6 + $0x8] sm:$0xff]  ;;  %s756_s10 = smov [#allocation9]  }
  0x37   :  { %v66_v2 = vld [vmem:[#allocation6 + $0x10] sm:$0xff]  ;;  %v555_v3 = vpack.c.bf16 %v65_v1, %v64_v0  ;;  %v67_v4 = vld [vmem:[#allocation6 + $0x18] sm:$0xff]  ;;  %v68_v6 = vld [vmem:[#allocation6 + $0x20] sm:$0xff]  ;;  %s379_s11 = sshll.u32 %s756_s10, 4  ;;  %s380_s11 = int_to_ptr.vmem [resolvable:$true] %s379_s11 }
  0x38   :  { %v559_v5 = vpack.c.bf16 %v67_v4, %v66_v2  ;;  %v69_v7 = vld [vmem:[#allocation6 + $0x28] sm:$0xff]  ;;  %v70_v9 = vld [vmem:[#allocation6 + $0x30] sm:$0xff]  ;;  %v71_v10 = vld [vmem:[#allocation6 + $0x38] sm:$0xff]  ;;  %s723_s12 = scalar_lea.vmem %s380_s11, 256  ;;  %p728_p11 = scmp.lt.s32.totalorder %s380_s11, %s380_s11 }
  0x39   :  { %556 = vmatprep.subr.bf16.mxu0 %v555_v3  ;;  %v563_v8 = vpack.c.bf16 %v69_v7, %v68_v6  ;;  %v62_v11 = vld [vmem:[#allocation3] sm:$0xff]  ;;  %v166_v12 = vld [vmem:[#allocation8] sm:$0xff]  ;;  %v167_v13 = vld [vmem:[#allocation8 + $0x8] sm:$0xff]  ;;  %v567_v20 = vpack.c.bf16 %v71_v10, %v70_v9  ;;  %p724_p10 = scmp.ne.s32.totalorder %s380_s11, %s723_s12  ;;  %p729_p12 = scmp.lt.s32.totalorder %s723_s12, %s723_s12 }
  0x3a   :  { %558 = vmatpush3.bf16.msra.mxu0 %v555_v3  ;;  %482 = vmatprep.mubr.f32.mxu0 %v62_v11  ;;  %v168_v14 = vld [vmem:[#allocation8 + $0x10] sm:$0xff]  ;;  %v587_v15 = vpack.c.bf16 %v167_v13, %v166_v12  ;;  %v169_v16 = vld [vmem:[#allocation8 + $0x18] sm:$0xff]  ;;  %v170_v18 = vld [vmem:[#allocation8 + $0x20] sm:$0xff] }
  0x3b   :  { %560 = vmatprep.subr.bf16.mxu0 %v559_v5  ;;  %v591_v17 = vpack.c.bf16 %v169_v16, %v168_v14  ;;  %v171_v19 = vld [vmem:[#allocation8 + $0x28] sm:$0xff]  ;;  %v72_v21 = vld [vmem:[#allocation6 + $0x40] sm:$0xff]  ;;  %v172_v24 = vld [vmem:[#allocation8 + $0x30] sm:$0xff]  ;;  %p730_p13 = por %p729_p12, %p728_p11 }
  0x3c   :  { %588 = vmatprep.subr.bf16.mxu1 %v587_v15  ;;  %v73_v22 = vld [vmem:[#allocation6 + $0x48] sm:$0xff]  ;;  %v595_v23 = vpack.c.bf16 %v171_v19, %v170_v18  ;;  %v173_v25 = vld [vmem:[#allocation8 + $0x38] sm:$0xff]  ;;  %v74_v27 = vld [vmem:[#allocation6 + $0x50] sm:$0xff] }
  0x3d   :  { %590 = vmatpush3.bf16.msra.mxu1 %v587_v15  ;;  %v571_v26 = vpack.c.bf16 %v73_v22, %v72_v21  ;;  %v75_v28 = vld [vmem:[#allocation6 + $0x58] sm:$0xff]  ;;  %v599_v29 = vpack.c.bf16 %v173_v25, %v172_v24  ;;  %v174_v30 = vld [vmem:[#allocation8 + $0x40] sm:$0xff]  ;;  %v175_v31 = vld [vmem:[#allocation8 + $0x48] sm:$0xff]  ;;  %p731_p0 = pnand %p730_p13, %p724_p10 }
  0x3e   :  { %562 = vmatpush3.bf16.msra.mxu0 %v559_v5  ;;  %592 = vmatprep.subr.bf16.mxu1 %v591_v17  ;;  %v575_v32 = vpack.c.bf16 %v75_v28, %v74_v27  ;;  %v76_v33 = vld [vmem:[#allocation6 + $0x60] sm:$0xff]  ;;  %v77_v34 = vld [vmem:[#allocation6 + $0x68] sm:$0xff]  ;;  %v603_v35 = vpack.c.bf16 %v175_v31, %v174_v30  ;;  %v176_v36 = vld [vmem:[#allocation8 + $0x50] sm:$0xff] }
  0x3f   :  { %564 = vmatprep.subr.bf16.mxu0 %v563_v8  ;;  %v177_v37 = vld [vmem:[#allocation8 + $0x58] sm:$0xff]  ;;  %v579_v38 = vpack.c.bf16 %v77_v34, %v76_v33  ;;  %v78_v39 = vld [vmem:[#allocation6 + $0x70] sm:$0xff]  ;;  %v178_v42 = vld [vmem:[#allocation8 + $0x60] sm:$0xff] }
  0x40   :  { %v79_v40 = vld [vmem:[#allocation6 + $0x78] sm:$0xff]  ;;  %v607_v41 = vpack.c.bf16 %v177_v37, %v176_v36  ;;  %v179_v43 = vld [vmem:[#allocation8 + $0x68] sm:$0xff]  ;;  %v180_v47 = vld [vmem:[#allocation8 + $0x70] sm:$0xff] }
  0x41   :  { %594 = vmatpush3.bf16.msra.mxu1 %v591_v17  ;;  %v583_v44 = vpack.c.bf16 %v79_v40, %v78_v39  ;;  %v611_v45 = vpack.c.bf16 %v179_v43, %v178_v42  ;;  %v63_v46 = vld [vmem:[#allocation3 + $0x8] sm:$0xff]  ;;  %v269_v50 = vld [vmem:[#allocation8 + $0x80] sm:$0xff]  ;;  %v270_v51 = vld [vmem:[#allocation8 + $0x88] sm:$0xff] }
  0x42   :  { %566 = vmatpush3.bf16.msra.mxu0 %v563_v8  ;;  %596 = vmatprep.subr.bf16.mxu1 %v595_v23  ;;  %v181_v48 = vld [vmem:[#allocation8 + $0x78] sm:$0xff]  ;;  %v271_v52 = vld [vmem:[#allocation8 + $0x90] sm:$0xff]  ;;  %v619_v53 = vpack.c.bf16 %v270_v51, %v269_v50  ;;  %v273_v56 = vld [vmem:[#allocation8 + $0xa0] sm:$0xff] }
  0x43   :  { %568 = vmatprep.subr.bf16.mxu0 %v567_v20  ;;  %v615_v49 = vpack.c.bf16 %v181_v48, %v180_v47  ;;  %v272_v54 = vld [vmem:[#allocation8 + $0x98] sm:$0xff]  ;;  %v274_v57 = vld [vmem:[#allocation8 + $0xa8] sm:$0xff]  ;;  %v275_v59 = vld [vmem:[#allocation8 + $0xb0] sm:$0xff] }
  0x44   :  { %v623_v55 = vpack.c.bf16 %v272_v54, %v271_v52  ;;  %v627_v58 = vpack.c.bf16 %v274_v57, %v273_v56  ;;  %v276_v60 = vld [vmem:[#allocation8 + $0xb8] sm:$0xff]  ;;  %v277_v62 = vld [vmem:[#allocation8 + $0xc0] sm:$0xff]  ;;  %v278_v63 = vld [vmem:[#allocation8 + $0xc8] sm:$0xff] }
  0x45   :  { %598 = vmatpush3.bf16.msra.mxu1 %v595_v23  ;;  %v631_v61 = vpack.c.bf16 %v276_v60, %v275_v59  ;;  %v635_v0 = vpack.c.bf16 %v278_v63, %v277_v62  ;;  %v279_v1 = vld [vmem:[#allocation8 + $0xd0] sm:$0xff]  ;;  %v280_v2 = vld [vmem:[#allocation8 + $0xd8] sm:$0xff]  ;;  %v281_v4 = vld [vmem:[#allocation8 + $0xe0] sm:$0xff] }
  0x46   :  { %570 = vmatpush3.bf16.msra.mxu0 %v567_v20  ;;  %600 = vmatprep.subr.bf16.mxu1 %v599_v29  ;;  %v639_v3 = vpack.c.bf16 %v280_v2, %v279_v1  ;;  %v282_v5 = vld [vmem:[#allocation8 + $0xe8] sm:$0xff]  ;;  %v392_v7 = vld [vmem:[%s865_s2] ss:$0 sm:$0xff]  ;;  %v284_v13 = vld [vmem:[#allocation8 + $0xf8] sm:$0xff] }
  0x47   :  { %572 = vmatprep.subr.bf16.mxu0 %v571_v26  ;;  %v643_v6 = vpack.c.bf16 %v282_v5, %v281_v4  ;;  %v283_v12 = vld [vmem:[#allocation8 + $0xf0] sm:$0xff] }
  0x48   :  { %v647_v14 = vpack.c.bf16 %v284_v13, %v283_v12  ;;  %v393_v15 = vld [vmem:[%s867_s4] ss:$0 sm:$0xff]  ;;  %v395_v20 = vld [vmem:[%s867_s4 + $0x1] ss:$0 sm:$0xff] }
  0x49   :  { %602 = vmatpush3.bf16.msra.mxu1 %v599_v29 }
  0x4a   :  { %574 = vmatpush3.bf16.msra.mxu0 %v571_v26  ;;  %604 = vmatprep.subr.bf16.mxu1 %v603_v35 }
  0x4b   :  { %576 = vmatprep.subr.bf16.mxu0 %v575_v32 }
  0x4d   :  { %606 = vmatpush3.bf16.msra.mxu1 %v603_v35 }
  0x4e   :  { %578 = vmatpush3.bf16.msra.mxu0 %v575_v32  ;;  %608 = vmatprep.subr.bf16.mxu1 %v607_v41 }
  0x4f   :  { %580 = vmatprep.subr.bf16.mxu0 %v579_v38 }
  0x51   :  { %610 = vmatpush3.bf16.msra.mxu1 %v607_v41 }
  0x52   :  { %582 = vmatpush3.bf16.msra.mxu0 %v579_v38  ;;  %612 = vmatprep.subr.bf16.mxu1 %v611_v45 }
  0x53   :  { %584 = vmatprep.subr.bf16.mxu0 %v583_v44 }
  0x55   :  { %614 = vmatpush3.bf16.msra.mxu1 %v611_v45 }
  0x56   :  { %586 = vmatpush3.bf16.msra.mxu0 %v583_v44  ;;  %616 = vmatprep.subr.bf16.mxu1 %v615_v49 }
  0x57   :  { %620 = vmatprep.subr.bf16.mxu0 %v619_v53 }
  0x59   :  { %483 = vmatmul.mubr.f32.vlgmr.msra.gmra.mrb[0].mxu0 %v63_v46  ;;  %618 = vmatpush3.bf16.msra.mxu1 %v615_v49 }
  0x5a   :  { %622 = vmatpush3.bf16.msra.mxu0 %v619_v53 }
  0x5b   :  { %624 = vmatprep.subr.bf16.mxu0 %v623_v55 }
  0x5e   :  { %626 = vmatpush3.bf16.msra.mxu0 %v623_v55 }
  0x5f   :  { %628 = vmatprep.subr.bf16.mxu0 %v627_v58 }
  0x62   :  { %630 = vmatpush3.bf16.msra.mxu0 %v627_v58 }
  0x63   :  { %632 = vmatprep.subr.bf16.mxu0 %v631_v61 }
  0x66   :  { %634 = vmatpush3.bf16.msra.mxu0 %v631_v61 }
  0x67   :  { %636 = vmatprep.subr.bf16.mxu0 %v635_v0 }
  0x6a   :  { %638 = vmatpush3.bf16.msra.mxu0 %v635_v0 }
  0x6b   :  { %640 = vmatprep.subr.bf16.mxu0 %v639_v3 }
  0x6e   :  { %642 = vmatpush3.bf16.msra.mxu0 %v639_v3 }
  0x6f   :  { %644 = vmatprep.subr.bf16.mxu0 %v643_v6 }
  0x72   :  { %646 = vmatpush3.bf16.msra.mxu0 %v643_v6 }
  0x73   :  { %648 = vmatprep.subr.bf16.mxu0 %v647_v14 }
  0x76   :  { %650 = vmatpush3.bf16.msra.mxu0 %v647_v14 }
 0x12c   :  { %v484_v8 = vpop.f32.mrb[0].mxu0 }
 0x12d   :  { %v153_v9 = vpop.f32.mrb[1].mxu0  ;;  %v159_v11 = vadd.f32 %v484_v8, %v392_v7 }
 0x12e   :  { %v154_v10 = vadd.f32 %v392_v7, %v153_v9 }
 0x130   :  { %517 = vmatprep.mubr.f32.mxu1 %v154_v10 }
 0x131   :  { %518 = vmatmul.mubr.f32.vlgmr.msra.gmra.mrb[0].mxu1 %v159_v11 }
 0x204   :  { %v519_v16 = vpop.f32.mrb[0].mxu1 }
 0x205   :  { %v255_v17 = vpop.f32.mrb[1].mxu1  ;;  %v261_v19 = vadd.f32 %v519_v16, %v393_v15 }
 0x206   :  { %v256_v18 = vadd.f32 %v393_v15, %v255_v17 }
 0x208   :  { %552 = vmatprep.mubr.f32.mxu0 %v256_v18 }
 0x209   :  { %553 = vmatmul.mubr.f32.vlgmr.msra.gmra.mrb[2].mxu0 %v261_v19 }
 0x2dc   :  { %v554_v21 = vpop.f32.mrb[2].mxu0 }
 0x2dd   :  { %v365_v22 = vadd.f32 %v554_v21, %v395_v20  ;;  %v359_v23 = vpop.f32.mrb[3].mxu0 }
 0x2de   :  { %v360_v24 = vadd.f32 %v395_v20, %v359_v23 }
 0x2df   :  { %373 = vst [vmem:[#allocation9 + $0x8] sm:$0xff] %v365_v22 }
 0x2e0   :  { %372 = vst [vmem:[#allocation9] sm:$0xff] %v360_v24 }
 0x2e1   :  { %734 = shalt.err (!%p731_p0)
}
 0x2e2   :  { %s735_s4 = scalar_lea.hbm %s868_s5, 256 }
 0x2e3   :  { %p736_p1 = scmp.ne.s32.totalorder %s868_s5, %s735_s4  ;;  %p739_p2 = scmp.lt.u32.totalorder %s735_s4, %s868_s5 }
 0x2e5   :  { %p741_p3 = pnand %p739_p2, %p736_p1 }
 0x2e7   :  { %744 = shalt.err (!%p741_p3)
}
 0x2e8   :  { %385 = dma.vmem_to_hbm [thread:$0]  %s380_s11, 256, %s868_s5, [#allocation5], %s753_s30, %s753_s30, %s754_s6  }
 0x2e9   :  { %749 = dma.done.wait [#allocation5], 256  }
 0x2ea   :  { %750 = vsyncadd [#allocation5], 4294967040 }
 0x2eb   :  { %389 = vsyncpa [#allocation4], 1 }
 0x2ec   :  { %390 = vsyncpa [#allocation7], 1 }
 0x2ed   :  { %391 = vsyncpa [#allocation5], 1 }

</bundles_post_ra>
